<compile_context>
chip_gen: v7x
topology: tpu7x:2x2x1
jax: 0.10.0
libtpu: 0.0.40
codegen_flags: <defaults>
</compile_context>

<pallas_src>
import functools

import jax
import jax.numpy as jnp
from jax.experimental import pallas as pl
from jax.experimental.pallas import tpu as pltpu


def _ceil_to(x, m):
    return ((x + m - 1) // m) * m


# ----------------------------------------------------------------------------
# Fused kernel: for l in range(n_layers): E <- A @ E ; out = mean_l(E_l)
# ----------------------------------------------------------------------------
def _fused_propagate_kernel(adj_ref, ego_ref, out_ref, acc_ref, e_scr,
                            *, tm, tk, n_pad, inv_layers):
    l = pl.program_id(0)          # layer (outer; carries the dependency)
    i = pl.program_id(1)          # row block of the propagated embeddings
    k = pl.program_id(2)          # reduction over columns of A / rows of E
    nl = pl.num_programs(0)
    nk = pl.num_programs(2)

    out_slot = l % 2              # half of e_scr receiving layer l's output
    in_slot = 1 - out_slot        # half of e_scr holding layer l's input

    # One-time staging: copy the initial concatenated embeddings (DMA'd once,
    # resident) into the layer-0 input half of the ping-pong scratch.
    @pl.when((l == 0) & (i == 0) & (k == 0))
    def _():
        e_scr[pl.ds(n_pad, n_pad), :] = ego_ref[...]

    @pl.when(k == 0)
    def _():
        acc_ref[...] = jnp.zeros_like(acc_ref)

    # bf16 x bf16 MXU matmul with f32 accumulation.
    src_off = pl.multiple_of(in_slot * n_pad + k * tk, tk)
    src = e_scr[pl.ds(src_off, tk), :]
    acc_ref[...] += jnp.dot(adj_ref[...], src,
                            preferred_element_type=jnp.float32)

    @pl.when(k == nk - 1)
    def _():
        rows = acc_ref[...]                       # E_{l+1}[row block i], f32
        row0 = pl.multiple_of(i * tm, tm)
        dst_off = pl.multiple_of(out_slot * n_pad + row0, tm)

        # Keep the propagated embeddings resident for the next layer.
        e_scr[pl.ds(dst_off, tm), :] = rows.astype(e_scr.dtype)

        # Running layer-sum lives directly in the resident f32 output block;
        # it is written back to HBM only once, at the end of the grid.
        @pl.when(l == 0)
        def _():
            out_ref[pl.ds(row0, tm), :] = rows

        @pl.when(l > 0)
        def _():
            out_ref[pl.ds(row0, tm), :] = out_ref[pl.ds(row0, tm), :] + rows

        @pl.when(l == nl - 1)
        def _():
            out_ref[pl.ds(row0, tm), :] = out_ref[pl.ds(row0, tm), :] * inv_layers


# ----------------------------------------------------------------------------
# Forward pass (perturbed=False), mirroring XSimGCL_Encoder.forward
# ----------------------------------------------------------------------------
@functools.partial(
    jax.jit, static_argnames=("n_layers", "layer_cl", "compute_dtype", "max_tile"))
def xsimgcl_forward(adj_norm, user_emb, item_emb, *, n_layers, layer_cl,
                    compute_dtype=jnp.bfloat16, max_tile=512):
    del layer_cl  # only used by the (unimplemented) perturbed=True branch
    user_num, d = user_emb.shape
    item_num = item_emb.shape[0]
    n = user_num + item_num
    assert adj_norm.shape == (n, n)

    ego = jnp.concatenate([user_emb, item_emb], axis=0)

    # Tile / pad so every grid axis divides exactly (no dropped rows).
    n_128 = _ceil_to(n, 128)
    tile = min(max_tile, n_128)
    n_pad = _ceil_to(n, tile)
    tm = tk = tile

    adj_c = adj_norm.astype(compute_dtype)   # halve the dominant HBM stream
    ego_c = ego.astype(compute_dtype)
    if n_pad != n:
        adj_c = jnp.pad(adj_c, ((0, n_pad - n), (0, n_pad - n)))
        ego_c = jnp.pad(ego_c, ((0, n_pad - n), (0, 0)))

    grid = (n_layers, n_pad // tm, n_pad // tk)

    kernel = functools.partial(
        _fused_propagate_kernel,
        tm=tm, tk=tk, n_pad=n_pad, inv_layers=1.0 / n_layers)

    mean_emb = pl.pallas_call(
        kernel,
        out_shape=jax.ShapeDtypeStruct((n_pad, d), jnp.float32),
        grid_spec=pltpu.PrefetchScalarGridSpec(
            num_scalar_prefetch=0,
            grid=grid,
            in_specs=[
                # adjacency: the only streamed operand, one (tm, tk) tile/step
                pl.BlockSpec((tm, tk), lambda l, i, k: (i, k)),
                # initial embeddings: DMA'd once, resident in VMEM
                pl.BlockSpec((n_pad, d), lambda l, i, k: (0, 0)),
            ],
            # layer-sum / mean: resident across the whole grid, 1 HBM writeback
            out_specs=pl.BlockSpec((n_pad, d), lambda l, i, k: (0, 0)),
            scratch_shapes=[
                pltpu.VMEM((tm, d), jnp.float32),            # k-tile accumulator
                pltpu.VMEM((2 * n_pad, d), compute_dtype),   # ping-pong resident E
            ],
        ),
        compiler_params=pltpu.CompilerParams(
            dimension_semantics=("arbitrary", "arbitrary", "arbitrary"),
        ),
    )(adj_c, ego_c)

    final = mean_emb[:n]
    user_all = final[:user_num]
    item_all = final[user_num:]
    # perturbed=False -> only (user_all, item_all) are returned, as in the module
    return user_all, item_all


# ----------------------------------------------------------------------------
# Deterministic graph construction (synthetic, no checkpoints)
# ----------------------------------------------------------------------------
def build_norm_adj(key, user_num, item_num):
    """LightGCN-style symmetric normalization D^-1/2 A D^-1/2, dense."""
    n = user_num + item_num
    r = (jax.random.uniform(key, (user_num, item_num)) < 0.05).astype(jnp.float32)
    adj = jnp.zeros((n, n), jnp.float32)
    adj = adj.at[:user_num, user_num:].set(r)
    adj = adj.at[user_num:, :user_num].set(r.T)
    deg = jnp.sum(adj, axis=1)
    d_inv_sqrt = jnp.where(deg > 0, 1.0 / jnp.sqrt(deg), 0.0)
    return adj * d_inv_sqrt[:, None] * d_inv_sqrt[None, :]


if __name__ == "__main__":
    user_num, item_num, emb_size = 112, 144, 64
    n_layers, layer_cl = 3, 1

    key = jax.random.PRNGKey(0)
    k_adj, k_u, k_i = jax.random.split(key, 3)

    glorot = jax.nn.initializers.glorot_uniform()   # xavier_uniform_ equivalent
    user_emb = glorot(k_u, (user_num, emb_size), jnp.float32)
    item_emb = glorot(k_i, (item_num, emb_size), jnp.float32)
    adj_norm = build_norm_adj(k_adj, user_num, item_num)

    user_all, item_all = xsimgcl_forward(
        adj_norm, user_emb, item_emb, n_layers=n_layers, layer_cl=layer_cl)
    jax.block_until_ready((user_all, item_all))

    # Pure-JAX reference mirroring the kernel precision (bf16 operands,
    # f32 accumulation, bf16 re-cast of E between layers).
    adj_ref = adj_norm.astype(jnp.bfloat16)
    ego_ref = jnp.concatenate([user_emb, item_emb], axis=0).astype(jnp.bfloat16)
    layer_sum = jnp.zeros((user_num + item_num, emb_size), jnp.float32)
    for _ in range(n_layers):
        new = jnp.dot(adj_ref, ego_ref, preferred_element_type=jnp.float32)
        layer_sum = layer_sum + new
        ego_ref = new.astype(jnp.bfloat16)
    ref = layer_sum / n_layers
    ref_user, ref_item = ref[:user_num], ref[user_num:]

    assert user_all.shape == (user_num, emb_size)
    assert item_all.shape == (item_num, emb_size)
    assert jnp.allclose(user_all, ref_user, atol=5e-3, rtol=5e-3)
    assert jnp.allclose(item_all, ref_item, atol=5e-3, rtol=5e-3)

    print("KERNEL_OK")
</pallas_src>

<mosaic_0001>
module attributes {stable_mosaic.version = 11 : i64} {
  func.func @_fused_propagate_kernel(%arg0: i32, %arg1: i32, %arg2: i32, %arg3: memref<256x256xbf16, #tpu.memory_space<vmem>>, %arg4: memref<256x64xbf16, #tpu.memory_space<vmem>>, %arg5: memref<256x64xf32, #tpu.memory_space<vmem>>, %arg6: memref<256x64xf32, #tpu.memory_space<vmem>>, %arg7: memref<512x64xbf16, #tpu.memory_space<vmem>>) attributes {dimension_semantics = [#tpu.dimension_semantics<arbitrary>, #tpu.dimension_semantics<arbitrary>, #tpu.dimension_semantics<arbitrary>], iteration_bounds = array<i64: 3, 1, 1>, scalar_prefetch = 0 : i64, scratch_operands = 2 : i64, tpu.core_type = #tpu.core_type<tc>, window_params = [{transform_indices = @transform_0, window_bounds = array<i64: 256, 256>}, {pipeline_mode = #tpu.pipeline_mode<synchronous>, transform_indices = @transform_1, window_bounds = array<i64: 256, 64>}, {pipeline_mode = #tpu.pipeline_mode<synchronous>, transform_indices = @transform_2, window_bounds = array<i64: 256, 64>}]} {
    %c2_i32 = arith.constant 2 : i32
    %c0_i32 = arith.constant 0 : i32
    %0 = arith.cmpi eq, %c2_i32, %c0_i32 : i32
    %c1_i32 = arith.constant 1 : i32
    %1 = arith.select %0, %c1_i32, %c2_i32 : i32
    %2 = arith.remsi %arg0, %1 : i32
    %c0_i32_0 = arith.constant 0 : i32
    %3 = arith.cmpi ne, %2, %c0_i32_0 : i32
    %c0_i32_1 = arith.constant 0 : i32
    %4 = arith.cmpi slt, %2, %c0_i32_1 : i32
    %c0_i32_2 = arith.constant 0 : i32
    %5 = arith.cmpi slt, %1, %c0_i32_2 : i32
    %6 = arith.xori %4, %5 : i1
    %7 = arith.andi %6, %3 : i1
    %8 = arith.addi %2, %1 : i32
    %9 = arith.select %7, %8, %2 : i32
    %c1_i32_3 = arith.constant 1 : i32
    %10 = arith.subi %c1_i32_3, %9 : i32
    %c0_i32_4 = arith.constant 0 : i32
    %11 = arith.cmpi eq, %arg0, %c0_i32_4 : i32
    %c0_i32_5 = arith.constant 0 : i32
    %12 = arith.cmpi eq, %arg1, %c0_i32_5 : i32
    %13 = arith.andi %11, %12 : i1
    %c0_i32_6 = arith.constant 0 : i32
    %14 = arith.cmpi eq, %arg2, %c0_i32_6 : i32
    %15 = arith.andi %13, %14 : i1
    %16 = arith.extui %15 : i1 to i32
    %c0_i32_7 = arith.constant 0 : i32
    %17 = arith.cmpi ne, %16, %c0_i32_7 : i32
    scf.if %17 {
      %c0_19 = arith.constant 0 : index
      %c0_20 = arith.constant 0 : index
      %35 = vector.load %arg4[%c0_19, %c0_20] : memref<256x64xbf16, #tpu.memory_space<vmem>>, vector<256x64xbf16>
      %c256 = arith.constant 256 : index
      %c0_21 = arith.constant 0 : index
      %36 = vector.load %arg7[%c256, %c0_21] : memref<512x64xbf16, #tpu.memory_space<vmem>>, vector<256x64xbf16>
      tpu.vector_store %arg7[%c256, %c0_21], %35 {strides = array<i32>} : memref<512x64xbf16, #tpu.memory_space<vmem>>, vector<256x64xbf16>,
    } else {
    }
    %c0_i32_8 = arith.constant 0 : i32
    %18 = arith.cmpi eq, %arg2, %c0_i32_8 : i32
    %19 = arith.extui %18 : i1 to i32
    %c0_i32_9 = arith.constant 0 : i32
    %20 = arith.cmpi ne, %19, %c0_i32_9 : i32
    scf.if %20 {
      %cst_19 = arith.constant 0.000000e+00 : f32
      %35 = vector.broadcast %cst_19 : f32 to vector<256x64xf32>
      %c0_20 = arith.constant 0 : index
      %c0_21 = arith.constant 0 : index
      %36 = vector.load %arg6[%c0_20, %c0_21] : memref<256x64xf32, #tpu.memory_space<vmem>>, vector<256x64xf32>
      tpu.vector_store %arg6[%c0_20, %c0_21], %35 {strides = array<i32>} : memref<256x64xf32, #tpu.memory_space<vmem>>, vector<256x64xf32>,
    } else {
    }
    %c256_i32 = arith.constant 256 : i32
    %21 = arith.muli %10, %c256_i32 : i32
    %c256_i32_10 = arith.constant 256 : i32
    %22 = arith.muli %arg2, %c256_i32_10 : i32
    %23 = arith.addi %21, %22 : i32
    %24 = tpu.assume_multiple %23, 256 : i32
    %25 = arith.index_cast %24 : i32 to index
    %c0 = arith.constant 0 : index
    %26 = vector.load %arg7[%25, %c0] : memref<512x64xbf16, #tpu.memory_space<vmem>>, vector<256x64xbf16>
    %c0_11 = arith.constant 0 : index
    %c0_12 = arith.constant 0 : index
    %27 = vector.load %arg6[%c0_11, %c0_12] : memref<256x64xf32, #tpu.memory_space<vmem>>, vector<256x64xf32>
    %c0_13 = arith.constant 0 : index
    %c0_14 = arith.constant 0 : index
    %28 = vector.load %arg3[%c0_13, %c0_14] : memref<256x256xbf16, #tpu.memory_space<vmem>>, vector<256x256xbf16>
    %cst = arith.constant dense<0.000000e+00> : vector<256x64xf32>
    %29 = tpu.matmul %28, %26, %cst {dimension_numbers = #tpu.dot_dimension_numbers<[1], [0], [0], [1], [0, 0, 1, 1], [], []>} : vector<256x256xbf16>, vector<256x64xbf16>, vector<256x64xf32> -> vector<256x64xf32>
    %30 = arith.addf %27, %29 : vector<256x64xf32>
    %c0_15 = arith.constant 0 : index
    %c0_16 = arith.constant 0 : index
    %31 = vector.load %arg6[%c0_15, %c0_16] : memref<256x64xf32, #tpu.memory_space<vmem>>, vector<256x64xf32>
    tpu.vector_store %arg6[%c0_15, %c0_16], %30 {strides = array<i32>} : memref<256x64xf32, #tpu.memory_space<vmem>>, vector<256x64xf32>,
    %c0_i32_17 = arith.constant 0 : i32
    %32 = arith.cmpi eq, %arg2, %c0_i32_17 : i32
    %33 = arith.extui %32 : i1 to i32
    %c0_i32_18 = arith.constant 0 : i32
    %34 = arith.cmpi ne, %33, %c0_i32_18 : i32
    scf.if %34 {
      %c0_19 = arith.constant 0 : index
      %c0_20 = arith.constant 0 : index
      %35 = vector.load %arg6[%c0_19, %c0_20] : memref<256x64xf32, #tpu.memory_space<vmem>>, vector<256x64xf32>
      %c256_i32_21 = arith.constant 256 : i32
      %36 = arith.muli %arg1, %c256_i32_21 : i32
      %37 = tpu.assume_multiple %36, 256 : i32
      %c256_i32_22 = arith.constant 256 : i32
      %38 = arith.muli %9, %c256_i32_22 : i32
      %39 = arith.addi %38, %37 : i32
      %40 = tpu.assume_multiple %39, 256 : i32
      %41 = arith.truncf %35 : vector<256x64xf32> to vector<256x64xbf16>
      %42 = arith.index_cast %40 : i32 to index
      %c0_23 = arith.constant 0 : index
      %43 = vector.load %arg7[%42, %c0_23] : memref<512x64xbf16, #tpu.memory_space<vmem>>, vector<256x64xbf16>
      tpu.vector_store %arg7[%42, %c0_23], %41 {strides = array<i32>} : memref<512x64xbf16, #tpu.memory_space<vmem>>, vector<256x64xbf16>,
      %c0_i32_24 = arith.constant 0 : i32
      %44 = arith.cmpi eq, %arg0, %c0_i32_24 : i32
      %45 = arith.extui %44 : i1 to i32
      %c0_i32_25 = arith.constant 0 : i32
      %46 = arith.cmpi ne, %45, %c0_i32_25 : i32
      scf.if %46 {
        %53 = arith.index_cast %37 : i32 to index
        %c0_30 = arith.constant 0 : index
        %54 = vector.load %arg5[%53, %c0_30] : memref<256x64xf32, #tpu.memory_space<vmem>>, vector<256x64xf32>
        tpu.vector_store %arg5[%53, %c0_30], %35 {strides = array<i32>} : memref<256x64xf32, #tpu.memory_space<vmem>>, vector<256x64xf32>,
      } else {
      }
      %c0_i32_26 = arith.constant 0 : i32
      %47 = arith.cmpi sgt, %arg0, %c0_i32_26 : i32
      %48 = arith.extui %47 : i1 to i32
      %c0_i32_27 = arith.constant 0 : i32
      %49 = arith.cmpi ne, %48, %c0_i32_27 : i32
      scf.if %49 {
        %53 = arith.index_cast %37 : i32 to index
        %c0_30 = arith.constant 0 : index
        %54 = vector.load %arg5[%53, %c0_30] : memref<256x64xf32, #tpu.memory_space<vmem>>, vector<256x64xf32>
        %55 = arith.addf %54, %35 : vector<256x64xf32>
        %56 = arith.index_cast %37 : i32 to index
        %c0_31 = arith.constant 0 : index
        %57 = vector.load %arg5[%56, %c0_31] : memref<256x64xf32, #tpu.memory_space<vmem>>, vector<256x64xf32>
        tpu.vector_store %arg5[%56, %c0_31], %55 {strides = array<i32>} : memref<256x64xf32, #tpu.memory_space<vmem>>, vector<256x64xf32>,
      } else {
      }
      %c2_i32_28 = arith.constant 2 : i32
      %50 = arith.cmpi eq, %arg0, %c2_i32_28 : i32
      %51 = arith.extui %50 : i1 to i32
      %c0_i32_29 = arith.constant 0 : i32
      %52 = arith.cmpi ne, %51, %c0_i32_29 : i32
      scf.if %52 {
        %53 = arith.index_cast %37 : i32 to index
        %c0_30 = arith.constant 0 : index
        %54 = vector.load %arg5[%53, %c0_30] : memref<256x64xf32, #tpu.memory_space<vmem>>, vector<256x64xf32>
        %cst_31 = arith.constant 0.333333343 : f32
        %55 = vector.broadcast %cst_31 : f32 to vector<256x64xf32>
        %56 = arith.mulf %54, %55 : vector<256x64xf32>
        %57 = arith.index_cast %37 : i32 to index
        %c0_32 = arith.constant 0 : index
        %58 = vector.load %arg5[%57, %c0_32] : memref<256x64xf32, #tpu.memory_space<vmem>>, vector<256x64xf32>
        tpu.vector_store %arg5[%57, %c0_32], %56 {strides = array<i32>} : memref<256x64xf32, #tpu.memory_space<vmem>>, vector<256x64xf32>,
      } else {
      }
    } else {
    }
    return
  }
  func.func @transform_0(%arg0: i32, %arg1: i32, %arg2: i32) -> (i32, i32) {
    %c0_i32 = arith.constant 0 : i32
    return %arg1, %arg2 : i32, i32
  }
  func.func @transform_1(%arg0: i32, %arg1: i32, %arg2: i32) -> (i32, i32) {
    %c0_i32 = arith.constant 0 : i32
    %c0_i32_0 = arith.constant 0 : i32
    %c0_i32_1 = arith.constant 0 : i32
    return %c0_i32, %c0_i32_0 : i32, i32
  }
  func.func @transform_2(%arg0: i32, %arg1: i32, %arg2: i32) -> (i32, i32) {
    %c0_i32 = arith.constant 0 : i32
    %c0_i32_0 = arith.constant 0 : i32
    %c0_i32_1 = arith.constant 0 : i32
    return %c0_i32, %c0_i32_0 : i32, i32
  }
}

</mosaic_0001>

<bundles_post_ra>
// kernel: xsimgcl_forward.1
= control target key start
LH: loop header
LB: loop body
LE: loop exit
PB: predicated region body
PF: predicated region fallthrough
CT: control target
= control target key end

     0   :  { %s1542_s9 = smov 0   ;;  %s1544_s10 = smov 0   ;;  %s2599_s0 = inlined_call_operand.vmem [shape: bf16[256,256], index: 0, kind: input, shape index: {}]   ;;  %s2600_s1 = inlined_call_operand.vmem [shape: bf16[256,64], index: 1, kind: input, shape index: {}]   ;;  %s2601_s2 = inlined_call_operand.vmem [shape: f32[256,64], index: 2, kind: output, shape index: {}]  }
   0x1   :  { %s1546_s11 = smov 0  }
   0x2 LB: > { %s31_s12 = sadd.s32 1, %s1520_s10  ;;  %p1220_p0 = scmp.ge.s32.totalorder %s1524_s11, 1  ;;  %s1524_s11 = sphi %s1546_s11, %s12_s11   ;;  %s1520_s10 = sphi %s1544_s10, %s2603_s10   ;;  %s1516_s9 = sphi %s1542_s9, %s2602_s9  }
   0x3   : > { %p33_p1 = scmp.ge.s32.totalorder %s31_s12, 3  ;;  %p135_p2 = scmp.lt.s32.totalorder %s1524_s11, 4 }
   0x5   : > { %s2605_s12 = smov (%p33_p1, %s31_s12), 0  ;;  %p136_p3 = pnand %p1220_p0, %p135_p2 }
   0x6   : > { %p170_p4 = scmp.lt.s32.totalorder (!%p136_p3), %s1516_s9, 0  ;;  %s171_s13 = ssub.s32 (!%p136_p3), 0, %s1516_s9 }
   0x7   : > { %139 = sbr.rel (%p136_p3) target bundleno = 395 (0x18b), region = 28  ;;  %s1221_s14 = smin.u32 (!%p136_p3), %s1516_s9, %s171_s13 }
   0x8   : > { %p183_p5 = scmp.eq.s32.totalorder (!%p136_p3), %s1516_s9, 0  ;;  %s173_s15 = sand.u32 (!%p136_p3), 1, %s1221_s14  }
   0x9   : > { %s174_s16 = ssub.s32 (!%p136_p3), 0, %s173_s15 }
   0xe   : > { %s2607_s16 = smov (!%p170_p4, %s174_s16), %s173_s15  ;;  %191 = sbr.rel (!%p183_p5) target bundleno = 24 (0x18), region = 32 }
   0xf   : > { %p1223_p6 = scmp.lt.s32.totalorder %s2607_s16, 0  ;;  %s180_s17 = sadd.s32 2, %s2607_s16  ;;  %v1438_v0 = vld [vmem:[%s2600_s1] sm:$0xff] (%p183_p5)   ;;  %vm320_vm0 = vcmask (%p183_p5), 523264   ;;  %v1439_v1 = vld [vmem:[%s2600_s1 + $0x8] sm:$0xff] (%p183_p5)   ;;  %v1440_v2 = vld [vmem:[%s2600_s1 + $0x10] sm:$0xff] (%p183_p5)  }
  0x10   : > { %321 = vst.msk [vmem:[#allocation3 + $0x80] sm:$0xff] (%p183_p5), %vm320_vm0, %v1438_v0  ;;  %322 = vst.msk [vmem:[#allocation3 + $0x88] sm:$0xff] (%p183_p5), %vm320_vm0, %v1439_v1  ;;  %v1441_v3 = vld [vmem:[%s2600_s1 + $0x18] sm:$0xff] (%p183_p5)   ;;  %v1442_v4 = vld [vmem:[%s2600_s1 + $0x20] sm:$0xff] (%p183_p5)  }
  0x11   : > { %s2609_s17 = smov (!%p1223_p6, %s180_s17), %s2607_s16  ;;  %323 = vst.msk [vmem:[#allocation3 + $0x90] sm:$0xff] (%p183_p5), %vm320_vm0, %v1440_v2  ;;  %324 = vst.msk [vmem:[#allocation3 + $0x98] sm:$0xff] (%p183_p5), %vm320_vm0, %v1441_v3  ;;  %v1443_v5 = vld [vmem:[%s2600_s1 + $0x28] sm:$0xff] (%p183_p5)   ;;  %v1444_v6 = vld [vmem:[%s2600_s1 + $0x30] sm:$0xff] (%p183_p5)  }
  0x12   : > { %s182_s18 = ssub.s32 1, %s2609_s17  ;;  %325 = vst.msk [vmem:[#allocation3 + $0xa0] sm:$0xff] (%p183_p5), %vm320_vm0, %v1442_v4  ;;  %326 = vst.msk [vmem:[#allocation3 + $0xa8] sm:$0xff] (%p183_p5), %vm320_vm0, %v1443_v5  ;;  %v1445_v7 = vld [vmem:[%s2600_s1 + $0x38] sm:$0xff] (%p183_p5)   ;;  %v1446_v8 = vld [vmem:[%s2600_s1 + $0x40] sm:$0xff] (%p183_p5)  }
  0x13   : > { %327 = vst.msk [vmem:[#allocation3 + $0xb0] sm:$0xff] (%p183_p5), %vm320_vm0, %v1444_v6  ;;  %328 = vst.msk [vmem:[#allocation3 + $0xb8] sm:$0xff] (%p183_p5), %vm320_vm0, %v1445_v7  ;;  %v1447_v9 = vld [vmem:[%s2600_s1 + $0x48] sm:$0xff] (%p183_p5)   ;;  %v1448_v10 = vld [vmem:[%s2600_s1 + $0x50] sm:$0xff] (%p183_p5)  }
  0x14   : > { %329 = vst.msk [vmem:[#allocation3 + $0xc0] sm:$0xff] (%p183_p5), %vm320_vm0, %v1446_v8  ;;  %330 = vst.msk [vmem:[#allocation3 + $0xc8] sm:$0xff] (%p183_p5), %vm320_vm0, %v1447_v9  ;;  %v1449_v11 = vld [vmem:[%s2600_s1 + $0x58] sm:$0xff] (%p183_p5)   ;;  %v1450_v12 = vld [vmem:[%s2600_s1 + $0x60] sm:$0xff] (%p183_p5)  }
  0x15   : > { %331 = vst.msk [vmem:[#allocation3 + $0xd0] sm:$0xff] %vm320_vm0, %v1448_v10  ;;  %332 = vst.msk [vmem:[#allocation3 + $0xd8] sm:$0xff] %vm320_vm0, %v1449_v11  ;;  %v1451_v13 = vld [vmem:[%s2600_s1 + $0x68] sm:$0xff]   ;;  %v1452_v14 = vld [vmem:[%s2600_s1 + $0x70] sm:$0xff]  }
  0x16   : > { %333 = vst.msk [vmem:[#allocation3 + $0xe0] sm:$0xff] %vm320_vm0, %v1450_v12  ;;  %334 = vst.msk [vmem:[#allocation3 + $0xe8] sm:$0xff] %vm320_vm0, %v1451_v13  ;;  %v1453_v15 = vld [vmem:[%s2600_s1 + $0x78] sm:$0xff]  }
  0x17   : > { %335 = vst.msk [vmem:[#allocation3 + $0xf0] sm:$0xff] %vm320_vm0, %v1452_v14  ;;  %336 = vst.msk [vmem:[#allocation3 + $0xf8] sm:$0xff] %vm320_vm0, %v1453_v15 }
  0x18 PF: > { %s1242_s29 = sshll.u32 %s182_s18, 8  ;;  %v1456_v16 = vld [vmem:[%s2599_s0 + $0x4] ss:$8 sps:$4 sm:$0xff]   ;;  %v1454_v34 = vld [vmem:[%s2599_s0] ss:$8 sps:$4 sm:$0xff]   ;;  %vm340_vm1 = vcmask 523264  }
  0x19   : > { %s376_s30 = sshra.s32 %s1242_s29, 4  ;;  %v1459_v17 = vld [vmem:[%s2599_s0 + $0x84] ss:$8 sps:$4 sm:$0xff]   ;;  %652 = vmatprep.mubr.bf16.mxu0 %v1456_v16  ;;  %v1457_v35 = vld [vmem:[%s2599_s0 + $0x80] ss:$8 sps:$4 sm:$0xff]   ;;  %v1526_v0 = vmov 0.0  }
  0x1a   : > { %s1243_s5 = sshll.u32 %s376_s30, 3  ;;  %716 = vmatprep.mubr.bf16.mxu1 %v1459_v17  ;;  %v1460_v36 = vld [vmem:[%s2599_s0 + $0x14] ss:$8 sps:$4 sm:$0xff]   ;;  %v1464_v38 = vld [vmem:[%s2599_s0 + $0x10] ss:$8 sps:$4 sm:$0xff]   ;;  %341 = vst.msk [vmem:[#allocation2] sm:$0xff] %vm340_vm1, %v1526_v0 }
  0x1b   : > { %s1641_s8 = scalar_lea.vmem [#allocation3], %s1243_s5  ;;  %v1462_v37 = vld [vmem:[%s2599_s0 + $0x94] ss:$8 sps:$4 sm:$0xff]   ;;  %v1465_v39 = vld [vmem:[%s2599_s0 + $0x90] ss:$8 sps:$4 sm:$0xff]   ;;  %342 = vst.msk [vmem:[#allocation2 + $0x8] sm:$0xff] %vm340_vm1, %v1526_v0 }
  0x1c   : > { %v1466_v40 = vld [vmem:[%s2599_s0 + $0x24] ss:$8 sps:$4 sm:$0xff]   ;;  %v1470_v42 = vld [vmem:[%s2599_s0 + $0x20] ss:$8 sps:$4 sm:$0xff]   ;;  %v1472_v44 = vld [vmem:[%s2599_s0 + $0x34] ss:$8 sps:$4 sm:$0xff]  }
  0x1d   : > { %v1468_v41 = vld [vmem:[%s2599_s0 + $0xa4] ss:$8 sps:$4 sm:$0xff]   ;;  %v1471_v43 = vld [vmem:[%s2599_s0 + $0xa0] ss:$8 sps:$4 sm:$0xff]   ;;  %v1474_v45 = vld [vmem:[%s2599_s0 + $0xb4] ss:$8 sps:$4 sm:$0xff]  }
  0x1e   : > { %v388_v18 = vld [vmem:[%s1641_s8 + $0x40] sm:$0xff]  ;;  %v389_v20 = vld [vmem:[%s1641_s8 + $0x48] sm:$0xff]  ;;  %v390_v22 = vld [vmem:[%s1641_s8 + $0x50] sm:$0xff]  ;;  %343 = vst.msk [vmem:[#allocation2 + $0x10] sm:$0xff] %vm340_vm1, %v1526_v0  ;;  %s1276_s28 = sshll.u32 %s2609_s17, 8  ;;  %p1278_p7 = scmp.ne.s32.totalorder %s1516_s9, 0 }
  0x1f   : > { %v380_v19 = vld [vmem:[%s1641_s8] sm:$0xff]  ;;  %1285 = vmatprep.subr.bf16.mxu0 %v388_v18  ;;  %1397 = vmatprep.subr.bf16.mxu1 %v388_v18  ;;  %v381_v21 = vld [vmem:[%s1641_s8 + $0x8] sm:$0xff]  ;;  %v382_v23 = vld [vmem:[%s1641_s8 + $0x10] sm:$0xff]  ;;  %344 = vst.msk [vmem:[#allocation2 + $0x18] sm:$0xff] %vm340_vm1, %v1526_v0  ;;  %s1786_s29 = sshra.s32 %s1276_s28, 4 }
  0x20   : > { %1286 = vmatpush3.bf16.msra.mxu0 %v380_v19  ;;  %1405 = vmatpush3.bf16.msra.mxu1 %v380_v19  ;;  %v391_v24 = vld [vmem:[%s1641_s8 + $0x58] sm:$0xff]  ;;  %v392_v26 = vld [vmem:[%s1641_s8 + $0x60] sm:$0xff]  ;;  %v393_v28 = vld [vmem:[%s1641_s8 + $0x68] sm:$0xff]  ;;  %345 = vst.msk [vmem:[#allocation2 + $0x20] sm:$0xff] %vm340_vm1, %v1526_v0  ;;  %s1277_s17 = sshll.u32 %s1786_s29, 3 }
  0x21   : > { %1287 = vmatprep.subr.bf16.mxu0 %v389_v20  ;;  %1398 = vmatprep.subr.bf16.mxu1 %v389_v20  ;;  %v383_v25 = vld [vmem:[%s1641_s8 + $0x18] sm:$0xff]  ;;  %v384_v27 = vld [vmem:[%s1641_s8 + $0x20] sm:$0xff]  ;;  %v385_v29 = vld [vmem:[%s1641_s8 + $0x28] sm:$0xff]  ;;  %346 = vst.msk [vmem:[#allocation2 + $0x28] sm:$0xff] %vm340_vm1, %v1526_v0  ;;  %s1805_s30 = scalar_lea.vmem [#allocation3], %s1277_s17 }
  0x22   : > { %v394_v30 = vld [vmem:[%s1641_s8 + $0x70] sm:$0xff]  ;;  %v395_v32 = vld [vmem:[%s1641_s8 + $0x78] sm:$0xff]  ;;  %v1478_v48 = vld [vmem:[%s2599_s0 + $0x44] ss:$8 sps:$4 sm:$0xff]   ;;  %347 = vst.msk [vmem:[#allocation2 + $0x30] sm:$0xff] %vm340_vm1, %v1526_v0 }
  0x23   : > { %v386_v31 = vld [vmem:[%s1641_s8 + $0x30] sm:$0xff]  ;;  %v387_v33 = vld [vmem:[%s1641_s8 + $0x38] sm:$0xff]  ;;  %v1480_v49 = vld [vmem:[%s2599_s0 + $0xc4] ss:$8 sps:$4 sm:$0xff]   ;;  %348 = vst.msk [vmem:[#allocation2 + $0x38] sm:$0xff] %vm340_vm1, %v1526_v0 }
  0x24   : > { %1288 = vmatpush3.bf16.msra.mxu0 %v381_v21  ;;  %1406 = vmatpush3.bf16.msra.mxu1 %v381_v21  ;;  %v1476_v46 = vld [vmem:[%s2599_s0 + $0x30] ss:$8 sps:$4 sm:$0xff]   ;;  %v1482_v50 = vld [vmem:[%s2599_s0 + $0x40] ss:$8 sps:$4 sm:$0xff]   ;;  %v1484_v52 = vld [vmem:[%s2599_s0 + $0x54] ss:$8 sps:$4 sm:$0xff]  }
  0x25   : > { %1289 = vmatprep.subr.bf16.mxu0 %v390_v22  ;;  %1399 = vmatprep.subr.bf16.mxu1 %v390_v22  ;;  %v1477_v47 = vld [vmem:[%s2599_s0 + $0xb0] ss:$8 sps:$4 sm:$0xff]   ;;  %v1483_v51 = vld [vmem:[%s2599_s0 + $0xc0] ss:$8 sps:$4 sm:$0xff]   ;;  %v1486_v53 = vld [vmem:[%s2599_s0 + $0xd4] ss:$8 sps:$4 sm:$0xff]  }
  0x26   : > { %v1488_v54 = vld [vmem:[%s2599_s0 + $0x50] ss:$8 sps:$4 sm:$0xff]   ;;  %v1490_v56 = vld [vmem:[%s2599_s0 + $0x64] ss:$8 sps:$4 sm:$0xff]   ;;  %v1494_v58 = vld [vmem:[%s2599_s0 + $0x60] ss:$8 sps:$4 sm:$0xff]  }
  0x27   : > { %v1489_v55 = vld [vmem:[%s2599_s0 + $0xd0] ss:$8 sps:$4 sm:$0xff]   ;;  %v1492_v57 = vld [vmem:[%s2599_s0 + $0xe4] ss:$8 sps:$4 sm:$0xff]   ;;  %v1495_v59 = vld [vmem:[%s2599_s0 + $0xe0] ss:$8 sps:$4 sm:$0xff]  }
  0x28   : > { %1290 = vmatpush3.bf16.msra.mxu0 %v382_v23  ;;  %1407 = vmatpush3.bf16.msra.mxu1 %v382_v23  ;;  %v1496_v60 = vld [vmem:[%s2599_s0 + $0x74] ss:$8 sps:$4 sm:$0xff]   ;;  %v1500_v62 = vld [vmem:[%s2599_s0 + $0x70] ss:$8 sps:$4 sm:$0xff]   ;;  %349 = vst.msk [vmem:[#allocation2 + $0x40] sm:$0xff] %vm340_vm1, %v1526_v0  ;;  %350 = vst.msk [vmem:[#allocation2 + $0x48] sm:$0xff] %vm340_vm1, %v1526_v0 }
  0x29   : > { %1291 = vmatprep.subr.bf16.mxu0 %v391_v24  ;;  %1400 = vmatprep.subr.bf16.mxu1 %v391_v24  ;;  %v1498_v61 = vld [vmem:[%s2599_s0 + $0xf4] ss:$8 sps:$4 sm:$0xff]   ;;  %v1501_v63 = vld [vmem:[%s2599_s0 + $0xf0] ss:$8 sps:$4 sm:$0xff]   ;;  %351 = vst.msk [vmem:[#allocation2 + $0x50] sm:$0xff] %vm340_vm1, %v1526_v0  ;;  %352 = vst.msk [vmem:[#allocation2 + $0x58] sm:$0xff] %vm340_vm1, %v1526_v0 }
  0x2a   : > { %353 = vst.msk [vmem:[#allocation2 + $0x60] sm:$0xff] %vm340_vm1, %v1526_v0  ;;  %354 = vst.msk [vmem:[#allocation2 + $0x68] sm:$0xff] %vm340_vm1, %v1526_v0  ;;  %v396_v3 = vld [vmem:[#allocation2] sm:$0xff]  ;;  %v397_v11 = vld [vmem:[#allocation2 + $0x8] sm:$0xff] }
  0x2b   : > { %355 = vst.msk [vmem:[#allocation2 + $0x70] sm:$0xff] %vm340_vm1, %v1526_v0  ;;  %356 = vst.msk [vmem:[#allocation2 + $0x78] sm:$0xff] %vm340_vm1, %v1526_v0  ;;  %v398_v23 = vld [vmem:[#allocation2 + $0x10] sm:$0xff] }
  0x2c   : > { %1292 = vmatpush3.bf16.msra.mxu0 %v383_v25  ;;  %1408 = vmatpush3.bf16.msra.mxu1 %v383_v25  ;;  %357 = vst.msk [vmem:[#allocation2 + $0x80] sm:$0xff] %vm340_vm1, %v1526_v0  ;;  %358 = vst.msk [vmem:[#allocation2 + $0x88] sm:$0xff] %vm340_vm1, %v1526_v0 }
  0x2d   : > { %1293 = vmatprep.subr.bf16.mxu0 %v392_v26  ;;  %1401 = vmatprep.subr.bf16.mxu1 %v392_v26  ;;  %359 = vst.msk [vmem:[#allocation2 + $0x90] sm:$0xff] %vm340_vm1, %v1526_v0  ;;  %360 = vst.msk [vmem:[#allocation2 + $0x98] sm:$0xff] %vm340_vm1, %v1526_v0 }
  0x2e   : > { %361 = vst.msk [vmem:[#allocation2 + $0xa0] sm:$0xff] %vm340_vm1, %v1526_v0  ;;  %362 = vst.msk [vmem:[#allocation2 + $0xa8] sm:$0xff] %vm340_vm1, %v1526_v0 }
  0x2f   : > { %363 = vst.msk [vmem:[#allocation2 + $0xb0] sm:$0xff] %vm340_vm1, %v1526_v0  ;;  %364 = vst.msk [vmem:[#allocation2 + $0xb8] sm:$0xff] %vm340_vm1, %v1526_v0 }
  0x30   : > { %1294 = vmatpush3.bf16.msra.mxu0 %v384_v27  ;;  %1409 = vmatpush3.bf16.msra.mxu1 %v384_v27  ;;  %365 = vst.msk [vmem:[#allocation2 + $0xc0] sm:$0xff] %vm340_vm1, %v1526_v0  ;;  %366 = vst.msk [vmem:[#allocation2 + $0xc8] sm:$0xff] %vm340_vm1, %v1526_v0 }
  0x31   : > { %1295 = vmatprep.subr.bf16.mxu0 %v393_v28  ;;  %1402 = vmatprep.subr.bf16.mxu1 %v393_v28  ;;  %367 = vst.msk [vmem:[#allocation2 + $0xd0] sm:$0xff] %vm340_vm1, %v1526_v0  ;;  %368 = vst.msk [vmem:[#allocation2 + $0xd8] sm:$0xff] %vm340_vm1, %v1526_v0 }
  0x32   : > { %369 = vst.msk [vmem:[#allocation2 + $0xe0] sm:$0xff] %vm340_vm1, %v1526_v0  ;;  %370 = vst.msk [vmem:[#allocation2 + $0xe8] sm:$0xff] %vm340_vm1, %v1526_v0 }
  0x33   : > { %371 = vst.msk [vmem:[#allocation2 + $0xf0] sm:$0xff] %vm340_vm1, %v1526_v0  ;;  %372 = vst.msk [vmem:[#allocation2 + $0xf8] sm:$0xff] %vm340_vm1, %v1526_v0  ;;  %v412_v5 = vld [vmem:[#allocation2 + $0x80] sm:$0xff]  ;;  %v413_v13 = vld [vmem:[#allocation2 + $0x88] sm:$0xff] }
  0x34   : > { %1296 = vmatpush3.bf16.msra.mxu0 %v385_v29  ;;  %1410 = vmatpush3.bf16.msra.mxu1 %v385_v29  ;;  %v414_v25 = vld [vmem:[#allocation2 + $0x90] sm:$0xff] }
  0x35   : > { %1297 = vmatprep.subr.bf16.mxu0 %v394_v30  ;;  %1403 = vmatprep.subr.bf16.mxu1 %v394_v30 }
  0x38   : > { %1298 = vmatpush3.bf16.msra.mxu0 %v386_v31  ;;  %1411 = vmatpush3.bf16.msra.mxu1 %v386_v31  ;;  %v399_v31 = vld [vmem:[#allocation2 + $0x18] sm:$0xff] }
  0x39   : > { %1299 = vmatprep.subr.bf16.mxu0 %v395_v32  ;;  %1404 = vmatprep.subr.bf16.mxu1 %v395_v32 }
  0x3c   : > { %1300 = vmatpush3.bf16.msra.mxu0 %v387_v33  ;;  %1412 = vmatpush3.bf16.msra.mxu1 %v387_v33  ;;  %v415_v33 = vld [vmem:[#allocation2 + $0x98] sm:$0xff] }
  0x3f   : > { %653 = vmatmul.mubr.bf16.vlgmr.msra.gmra.mrb[0].mxu0 %v1454_v34  ;;  %717 = vmatmul.mubr.bf16.vlgmr.msra.gmra.mrb[0].mxu1 %v1457_v35 }
  0x40   : > { %660 = vmatprep.mubr.bf16.mxu0 %v1460_v36  ;;  %724 = vmatprep.mubr.bf16.mxu1 %v1462_v37 }
  0x47   : > { %661 = vmatmul.mubr.bf16.gmra.mrb[4].mxu0 %v1464_v38  ;;  %725 = vmatmul.mubr.bf16.gmra.mrb[4].mxu1 %v1465_v39 }
  0x48   : > { %668 = vmatprep.mubr.bf16.mxu0 %v1466_v40  ;;  %732 = vmatprep.mubr.bf16.mxu1 %v1468_v41 }
  0x4f   : > { %669 = vmatmul.mubr.bf16.gmra.mrb[8].mxu0 %v1470_v42  ;;  %733 = vmatmul.mubr.bf16.gmra.mrb[8].mxu1 %v1471_v43 }
  0x50   : > { %676 = vmatprep.mubr.bf16.mxu0 %v1472_v44  ;;  %740 = vmatprep.mubr.bf16.mxu1 %v1474_v45 }
  0x57   : > { %677 = vmatmul.mubr.bf16.gmra.mrb[12].mxu0 %v1476_v46  ;;  %741 = vmatmul.mubr.bf16.gmra.mrb[12].mxu1 %v1477_v47 }
  0x58   : > { %684 = vmatprep.mubr.bf16.mxu0 %v1478_v48  ;;  %748 = vmatprep.mubr.bf16.mxu1 %v1480_v49  ;;  %v400_v49 = vld [vmem:[#allocation2 + $0x20] sm:$0xff] }
  0x5f   : > { %685 = vmatmul.mubr.bf16.gmra.mrb[16].mxu0 %v1482_v50  ;;  %749 = vmatmul.mubr.bf16.gmra.mrb[16].mxu1 %v1483_v51  ;;  %v416_v51 = vld [vmem:[#allocation2 + $0xa0] sm:$0xff] }
  0x60   : > { %692 = vmatprep.mubr.bf16.mxu0 %v1484_v52  ;;  %756 = vmatprep.mubr.bf16.mxu1 %v1486_v53 }
  0x67   : > { %693 = vmatmul.mubr.bf16.gmra.mrb[20].mxu0 %v1488_v54  ;;  %757 = vmatmul.mubr.bf16.gmra.mrb[20].mxu1 %v1489_v55 }
  0x68   : > { %700 = vmatprep.mubr.bf16.mxu0 %v1490_v56  ;;  %764 = vmatprep.mubr.bf16.mxu1 %v1492_v57  ;;  %v401_v57 = vld [vmem:[#allocation2 + $0x28] sm:$0xff] }
  0x6f   : > { %701 = vmatmul.mubr.bf16.gmra.mrb[24].mxu0 %v1494_v58  ;;  %765 = vmatmul.mubr.bf16.gmra.mrb[24].mxu1 %v1495_v59  ;;  %v417_v59 = vld [vmem:[#allocation2 + $0xa8] sm:$0xff] }
  0x70   : > { %708 = vmatprep.mubr.bf16.mxu0 %v1496_v60  ;;  %772 = vmatprep.mubr.bf16.mxu1 %v1498_v61 }
  0x77   : > { %709 = vmatmul.mubr.bf16.gmra.mrb[28].mxu0 %v1500_v62  ;;  %773 = vmatmul.mubr.bf16.gmra.mrb[28].mxu1 %v1501_v63 }
 0x112   : > { %v1301_v1 = vpop.f32.mrb[0].mxu0  ;;  %v1349_v2 = vpop.f32.mrb[0].mxu1 }
 0x113   : > { %v1302_v4 = vpop.f32.mrb[1].mxu0  ;;  %v1350_v6 = vpop.f32.mrb[1].mxu1 }
 0x114   : > { %v1303_v7 = vadd.f32 %v1302_v4, %v1301_v1  ;;  %v1351_v8 = vadd.f32 %v1350_v6, %v1349_v2  ;;  %v1304_v9 = vpop.f32.mrb[2].mxu0  ;;  %v1352_v10 = vpop.f32.mrb[2].mxu1 }
 0x115   : > { %v1305_v12 = vpop.f32.mrb[3].mxu0  ;;  %v1353_v14 = vpop.f32.mrb[3].mxu1 }
 0x116   : > { %v781_v15 = vadd.f32 %v1303_v7, %v396_v3  ;;  %v797_v16 = vadd.f32 %v1351_v8, %v412_v5  ;;  %v1306_v17 = vadd.f32 %v1305_v12, %v1304_v9  ;;  %v1354_v18 = vadd.f32 %v1353_v14, %v1352_v10 }
 0x118   : > { %814 = vst.msk [vmem:[#allocation2] sm:$0xff] %vm340_vm1, %v781_v15  ;;  %830 = vst.msk [vmem:[#allocation2 + $0x80] sm:$0xff] %vm340_vm1, %v797_v16  ;;  %v782_v19 = vadd.f32 %v1306_v17, %v397_v11  ;;  %v798_v20 = vadd.f32 %v1354_v18, %v413_v13  ;;  %v402_v11 = vld [vmem:[#allocation2 + $0x30] sm:$0xff] }
 0x119   : > { %v418_v13 = vld [vmem:[#allocation2 + $0xb0] sm:$0xff] }
 0x11a   : > { %815 = vst.msk [vmem:[#allocation2 + $0x8] sm:$0xff] %vm340_vm1, %v782_v19  ;;  %831 = vst.msk [vmem:[#allocation2 + $0x88] sm:$0xff] %vm340_vm1, %v798_v20  ;;  %v1307_v21 = vpop.f32.mrb[4].mxu0  ;;  %v1355_v22 = vpop.f32.mrb[4].mxu1  ;;  %v403_v19 = vld [vmem:[#allocation2 + $0x38] sm:$0xff] }
 0x11b   : > { %v1308_v24 = vpop.f32.mrb[5].mxu0  ;;  %v1356_v26 = vpop.f32.mrb[5].mxu1 }
 0x11c   : > { %v1309_v27 = vadd.f32 %v1308_v24, %v1307_v21  ;;  %v1357_v28 = vadd.f32 %v1356_v26, %v1355_v22  ;;  %v1310_v29 = vpop.f32.mrb[6].mxu0  ;;  %v1358_v30 = vpop.f32.mrb[6].mxu1  ;;  %v419_v21 = vld [vmem:[#allocation2 + $0xb8] sm:$0xff] }
 0x11d   : > { %v1311_v32 = vpop.f32.mrb[7].mxu0  ;;  %v1359_v34 = vpop.f32.mrb[7].mxu1 }
 0x11e   : > { %v783_v35 = vadd.f32 %v1309_v27, %v398_v23  ;;  %v799_v36 = vadd.f32 %v1357_v28, %v414_v25  ;;  %v1312_v37 = vadd.f32 %v1311_v32, %v1310_v29  ;;  %v1360_v38 = vadd.f32 %v1359_v34, %v1358_v30 }
 0x11f   : > { %v1789_v39 = vld [vmem:[#allocation2] sm:$0xff] }
 0x120   : > { %816 = vst.msk [vmem:[#allocation2 + $0x10] sm:$0xff] %vm340_vm1, %v783_v35  ;;  %832 = vst.msk [vmem:[#allocation2 + $0x90] sm:$0xff] %vm340_vm1, %v799_v36  ;;  %v784_v40 = vadd.f32 %v1312_v37, %v399_v31  ;;  %v800_v41 = vadd.f32 %v1360_v38, %v415_v33  ;;  %v1793_v42 = vld [vmem:[#allocation2 + $0x80] sm:$0xff] }
 0x121   : > { %v1795_v43 = vld [vmem:[#allocation2 + $0x8] sm:$0xff]  ;;  %v404_v37 = vld [vmem:[#allocation2 + $0x40] sm:$0xff]  ;;  %924 = vst.msk [vmem:[%s2601_s2] sm:$0xff] (!%p1278_p7), %vm340_vm1, %v1789_v39  ;;  %940 = vst.msk [vmem:[%s2601_s2 + $0x80] sm:$0xff] (!%p1278_p7), %vm340_vm1, %v1793_v42 }
 0x122   : > { %v1797_v44 = vld [vmem:[#allocation2 + $0x88] sm:$0xff]  ;;  %v884_v45 = vpack.c.bf16 %v1795_v43, %v1789_v39  ;;  %817 = vst.msk [vmem:[#allocation2 + $0x18] sm:$0xff] %vm340_vm1, %v784_v40  ;;  %833 = vst.msk [vmem:[#allocation2 + $0x98] sm:$0xff] %vm340_vm1, %v800_v41  ;;  %v1313_v47 = vpop.f32.mrb[8].mxu0  ;;  %v1361_v48 = vpop.f32.mrb[8].mxu1  ;;  %v420_v40 = vld [vmem:[#allocation2 + $0xc0] sm:$0xff] }
 0x123   : > { %v892_v46 = vpack.c.bf16 %v1797_v44, %v1793_v42  ;;  %v1314_v50 = vpop.f32.mrb[9].mxu0  ;;  %v1362_v52 = vpop.f32.mrb[9].mxu1  ;;  %925 = vst.msk [vmem:[%s2601_s2 + $0x8] sm:$0xff] (!%p1278_p7), %vm340_vm1, %v1795_v43  ;;  %941 = vst.msk [vmem:[%s2601_s2 + $0x88] sm:$0xff] (!%p1278_p7), %vm340_vm1, %v1797_v44 }
 0x124   : > { %904 = vst.msk [vmem:[%s1805_s30] sm:$0xff] %vm340_vm1, %v884_v45  ;;  %v1315_v53 = vadd.f32 %v1314_v50, %v1313_v47  ;;  %v1363_v54 = vadd.f32 %v1362_v52, %v1361_v48  ;;  %v1316_v55 = vpop.f32.mrb[10].mxu0  ;;  %v1364_v56 = vpop.f32.mrb[10].mxu1 }
 0x125   : > { %912 = vst.msk [vmem:[%s1805_s30 + $0x40] sm:$0xff] %vm340_vm1, %v892_v46  ;;  %v1317_v58 = vpop.f32.mrb[11].mxu0  ;;  %v1365_v60 = vpop.f32.mrb[11].mxu1 }
 0x126   : > { %v785_v61 = vadd.f32 %v1315_v53, %v400_v49  ;;  %v801_v62 = vadd.f32 %v1363_v54, %v416_v51  ;;  %v1318_v63 = vadd.f32 %v1317_v58, %v1316_v55  ;;  %v1366_v0 = vadd.f32 %v1365_v60, %v1364_v56  ;;  %v405_v49 = vld [vmem:[#allocation2 + $0x48] sm:$0xff] }
 0x127   : > { %v1811_v1 = vld [vmem:[#allocation2 + $0x10] sm:$0xff]  ;;  %v421_v51 = vld [vmem:[#allocation2 + $0xc8] sm:$0xff] }
 0x128   : > { %818 = vst.msk [vmem:[#allocation2 + $0x20] sm:$0xff] %vm340_vm1, %v785_v61  ;;  %834 = vst.msk [vmem:[#allocation2 + $0xa0] sm:$0xff] %vm340_vm1, %v801_v62  ;;  %v786_v2 = vadd.f32 %v1318_v63, %v401_v57  ;;  %v802_v3 = vadd.f32 %v1366_v0, %v417_v59  ;;  %v1815_v4 = vld [vmem:[#allocation2 + $0x90] sm:$0xff] }
 0x129   : > { %v1817_v5 = vld [vmem:[#allocation2 + $0x18] sm:$0xff]  ;;  %926 = vst.msk [vmem:[%s2601_s2 + $0x10] sm:$0xff] (!%p1278_p7), %vm340_vm1, %v1811_v1  ;;  %942 = vst.msk [vmem:[%s2601_s2 + $0x90] sm:$0xff] (!%p1278_p7), %vm340_vm1, %v1815_v4 }
 0x12a   : > { %v1819_v6 = vld [vmem:[#allocation2 + $0x98] sm:$0xff]  ;;  %v885_v7 = vpack.c.bf16 %v1817_v5, %v1811_v1  ;;  %819 = vst.msk [vmem:[#allocation2 + $0x28] sm:$0xff] %vm340_vm1, %v786_v2  ;;  %835 = vst.msk [vmem:[#allocation2 + $0xa8] sm:$0xff] %vm340_vm1, %v802_v3  ;;  %v1319_v9 = vpop.f32.mrb[12].mxu0  ;;  %v1367_v10 = vpop.f32.mrb[12].mxu1 }
 0x12b   : > { %v893_v8 = vpack.c.bf16 %v1819_v6, %v1815_v4  ;;  %v1320_v12 = vpop.f32.mrb[13].mxu0  ;;  %v1368_v14 = vpop.f32.mrb[13].mxu1  ;;  %927 = vst.msk [vmem:[%s2601_s2 + $0x18] sm:$0xff] (!%p1278_p7), %vm340_vm1, %v1817_v5  ;;  %943 = vst.msk [vmem:[%s2601_s2 + $0x98] sm:$0xff] (!%p1278_p7), %vm340_vm1, %v1819_v6 }
 0x12c   : > { %905 = vst.msk [vmem:[%s1805_s30 + $0x8] sm:$0xff] %vm340_vm1, %v885_v7  ;;  %v1321_v15 = vadd.f32 %v1320_v12, %v1319_v9  ;;  %v1369_v16 = vadd.f32 %v1368_v14, %v1367_v10  ;;  %v1322_v17 = vpop.f32.mrb[14].mxu0  ;;  %v1370_v18 = vpop.f32.mrb[14].mxu1  ;;  %v406_v7 = vld [vmem:[#allocation2 + $0x50] sm:$0xff] }
 0x12d   : > { %913 = vst.msk [vmem:[%s1805_s30 + $0x48] sm:$0xff] %vm340_vm1, %v893_v8  ;;  %v1323_v20 = vpop.f32.mrb[15].mxu0  ;;  %v1371_v22 = vpop.f32.mrb[15].mxu1  ;;  %v422_v9 = vld [vmem:[#allocation2 + $0xd0] sm:$0xff] }
 0x12e   : > { %v787_v23 = vadd.f32 %v1321_v15, %v402_v11  ;;  %v803_v24 = vadd.f32 %v1369_v16, %v418_v13  ;;  %v1324_v25 = vadd.f32 %v1323_v20, %v1322_v17  ;;  %v1372_v26 = vadd.f32 %v1371_v22, %v1370_v18  ;;  %v407_v15 = vld [vmem:[#allocation2 + $0x58] sm:$0xff] }
 0x12f   : > { %v1831_v27 = vld [vmem:[#allocation2 + $0x20] sm:$0xff]  ;;  %v423_v17 = vld [vmem:[#allocation2 + $0xd8] sm:$0xff] }
 0x130   : > { %820 = vst.msk [vmem:[#allocation2 + $0x30] sm:$0xff] %vm340_vm1, %v787_v23  ;;  %836 = vst.msk [vmem:[#allocation2 + $0xb0] sm:$0xff] %vm340_vm1, %v803_v24  ;;  %v788_v28 = vadd.f32 %v1324_v25, %v403_v19  ;;  %v804_v29 = vadd.f32 %v1372_v26, %v419_v21  ;;  %v1835_v30 = vld [vmem:[#allocation2 + $0xa0] sm:$0xff] }
 0x131   : > { %v1837_v31 = vld [vmem:[#allocation2 + $0x28] sm:$0xff]  ;;  %928 = vst.msk [vmem:[%s2601_s2 + $0x20] sm:$0xff] (!%p1278_p7), %vm340_vm1, %v1831_v27  ;;  %944 = vst.msk [vmem:[%s2601_s2 + $0xa0] sm:$0xff] (!%p1278_p7), %vm340_vm1, %v1835_v30 }
 0x132   : > { %v1839_v32 = vld [vmem:[#allocation2 + $0xa8] sm:$0xff]  ;;  %v886_v33 = vpack.c.bf16 %v1837_v31, %v1831_v27  ;;  %821 = vst.msk [vmem:[#allocation2 + $0x38] sm:$0xff] %vm340_vm1, %v788_v28  ;;  %837 = vst.msk [vmem:[#allocation2 + $0xb8] sm:$0xff] %vm340_vm1, %v804_v29  ;;  %v1325_v35 = vpop.f32.mrb[16].mxu0  ;;  %v1373_v36 = vpop.f32.mrb[16].mxu1 }
 0x133   : > { %v894_v34 = vpack.c.bf16 %v1839_v32, %v1835_v30  ;;  %v1326_v38 = vpop.f32.mrb[17].mxu0  ;;  %v1374_v41 = vpop.f32.mrb[17].mxu1  ;;  %929 = vst.msk [vmem:[%s2601_s2 + $0x28] sm:$0xff] (!%p1278_p7), %vm340_vm1, %v1837_v31  ;;  %945 = vst.msk [vmem:[%s2601_s2 + $0xa8] sm:$0xff] (!%p1278_p7), %vm340_vm1, %v1839_v32 }
 0x134   : > { %906 = vst.msk [vmem:[%s1805_s30 + $0x10] sm:$0xff] %vm340_vm1, %v886_v33  ;;  %v1327_v45 = vadd.f32 %v1326_v38, %v1325_v35  ;;  %v1375_v46 = vadd.f32 %v1374_v41, %v1373_v36  ;;  %v1328_v47 = vpop.f32.mrb[18].mxu0  ;;  %v1376_v48 = vpop.f32.mrb[18].mxu1 }
 0x135   : > { %914 = vst.msk [vmem:[%s1805_s30 + $0x50] sm:$0xff] %vm340_vm1, %v894_v34  ;;  %v1329_v50 = vpop.f32.mrb[19].mxu0  ;;  %v1377_v52 = vpop.f32.mrb[19].mxu1 }
 0x136   : > { %v789_v53 = vadd.f32 %v1327_v45, %v404_v37  ;;  %v805_v54 = vadd.f32 %v1375_v46, %v420_v40  ;;  %v1330_v55 = vadd.f32 %v1329_v50, %v1328_v47  ;;  %v1378_v56 = vadd.f32 %v1377_v52, %v1376_v48  ;;  %v408_v37 = vld [vmem:[#allocation2 + $0x60] sm:$0xff] }
 0x137   : > { %v1851_v57 = vld [vmem:[#allocation2 + $0x30] sm:$0xff]  ;;  %v424_v40 = vld [vmem:[#allocation2 + $0xe0] sm:$0xff] }
 0x138   : > { %822 = vst.msk [vmem:[#allocation2 + $0x40] sm:$0xff] %vm340_vm1, %v789_v53  ;;  %838 = vst.msk [vmem:[#allocation2 + $0xc0] sm:$0xff] %vm340_vm1, %v805_v54  ;;  %v790_v58 = vadd.f32 %v1330_v55, %v405_v49  ;;  %v806_v59 = vadd.f32 %v1378_v56, %v421_v51  ;;  %v1855_v60 = vld [vmem:[#allocation2 + $0xb0] sm:$0xff]  ;;  %v409_v49 = vld [vmem:[#allocation2 + $0x68] sm:$0xff] }
 0x139   : > { %v1857_v61 = vld [vmem:[#allocation2 + $0x38] sm:$0xff]  ;;  %v425_v51 = vld [vmem:[#allocation2 + $0xe8] sm:$0xff]  ;;  %930 = vst.msk [vmem:[%s2601_s2 + $0x30] sm:$0xff] (!%p1278_p7), %vm340_vm1, %v1851_v57  ;;  %946 = vst.msk [vmem:[%s2601_s2 + $0xb0] sm:$0xff] (!%p1278_p7), %vm340_vm1, %v1855_v60 }
 0x13a   : > { %v1859_v62 = vld [vmem:[#allocation2 + $0xb8] sm:$0xff]  ;;  %v887_v63 = vpack.c.bf16 %v1857_v61, %v1851_v57  ;;  %823 = vst.msk [vmem:[#allocation2 + $0x48] sm:$0xff] %vm340_vm1, %v790_v58  ;;  %839 = vst.msk [vmem:[#allocation2 + $0xc8] sm:$0xff] %vm340_vm1, %v806_v59  ;;  %v1331_v2 = vpop.f32.mrb[20].mxu0  ;;  %v1379_v3 = vpop.f32.mrb[20].mxu1 }
 0x13b   : > { %v895_v0 = vpack.c.bf16 %v1859_v62, %v1855_v60  ;;  %v1332_v8 = vpop.f32.mrb[21].mxu0  ;;  %v1380_v10 = vpop.f32.mrb[21].mxu1  ;;  %931 = vst.msk [vmem:[%s2601_s2 + $0x38] sm:$0xff] (!%p1278_p7), %vm340_vm1, %v1857_v61  ;;  %947 = vst.msk [vmem:[%s2601_s2 + $0xb8] sm:$0xff] (!%p1278_p7), %vm340_vm1, %v1859_v62 }
 0x13c   : > { %907 = vst.msk [vmem:[%s1805_s30 + $0x18] sm:$0xff] %vm340_vm1, %v887_v63  ;;  %v1333_v11 = vadd.f32 %v1332_v8, %v1331_v2  ;;  %v1381_v12 = vadd.f32 %v1380_v10, %v1379_v3  ;;  %v1334_v13 = vpop.f32.mrb[22].mxu0  ;;  %v1382_v14 = vpop.f32.mrb[22].mxu1 }
 0x13d   : > { %915 = vst.msk [vmem:[%s1805_s30 + $0x58] sm:$0xff] %vm340_vm1, %v895_v0  ;;  %v1335_v16 = vpop.f32.mrb[23].mxu0  ;;  %v1383_v18 = vpop.f32.mrb[23].mxu1 }
 0x13e   : > { %v791_v19 = vadd.f32 %v1333_v11, %v406_v7  ;;  %v807_v20 = vadd.f32 %v1381_v12, %v422_v9  ;;  %v1336_v21 = vadd.f32 %v1335_v16, %v1334_v13  ;;  %v1384_v22 = vadd.f32 %v1383_v18, %v1382_v14  ;;  %v410_v11 = vld [vmem:[#allocation2 + $0x70] sm:$0xff] }
 0x13f   : > { %v1871_v23 = vld [vmem:[#allocation2 + $0x40] sm:$0xff]  ;;  %v426_v13 = vld [vmem:[#allocation2 + $0xf0] sm:$0xff] }
 0x140   : > { %824 = vst.msk [vmem:[#allocation2 + $0x50] sm:$0xff] %vm340_vm1, %v791_v19  ;;  %840 = vst.msk [vmem:[#allocation2 + $0xd0] sm:$0xff] %vm340_vm1, %v807_v20  ;;  %v792_v24 = vadd.f32 %v1336_v21, %v407_v15  ;;  %v808_v25 = vadd.f32 %v1384_v22, %v423_v17  ;;  %v1875_v26 = vld [vmem:[#allocation2 + $0xc0] sm:$0xff]  ;;  %v411_v19 = vld [vmem:[#allocation2 + $0x78] sm:$0xff] }
 0x141   : > { %v1877_v28 = vld [vmem:[#allocation2 + $0x48] sm:$0xff]  ;;  %v427_v21 = vld [vmem:[#allocation2 + $0xf8] sm:$0xff]  ;;  %932 = vst.msk [vmem:[%s2601_s2 + $0x40] sm:$0xff] (!%p1278_p7), %vm340_vm1, %v1871_v23  ;;  %948 = vst.msk [vmem:[%s2601_s2 + $0xc0] sm:$0xff] (!%p1278_p7), %vm340_vm1, %v1875_v26 }
 0x142   : > { %v1879_v29 = vld [vmem:[#allocation2 + $0xc8] sm:$0xff]  ;;  %v888_v33 = vpack.c.bf16 %v1877_v28, %v1871_v23  ;;  %825 = vst.msk [vmem:[#allocation2 + $0x58] sm:$0xff] %vm340_vm1, %v792_v24  ;;  %841 = vst.msk [vmem:[#allocation2 + $0xd8] sm:$0xff] %vm340_vm1, %v808_v25  ;;  %v1337_v35 = vpop.f32.mrb[24].mxu0  ;;  %v1385_v36 = vpop.f32.mrb[24].mxu1 }
 0x143   : > { %v896_v34 = vpack.c.bf16 %v1879_v29, %v1875_v26  ;;  %v1338_v38 = vpop.f32.mrb[25].mxu0  ;;  %v1386_v41 = vpop.f32.mrb[25].mxu1  ;;  %933 = vst.msk [vmem:[%s2601_s2 + $0x48] sm:$0xff] (!%p1278_p7), %vm340_vm1, %v1877_v28  ;;  %949 = vst.msk [vmem:[%s2601_s2 + $0xc8] sm:$0xff] (!%p1278_p7), %vm340_vm1, %v1879_v29 }
 0x144   : > { %908 = vst.msk [vmem:[%s1805_s30 + $0x20] sm:$0xff] %vm340_vm1, %v888_v33  ;;  %v1339_v45 = vadd.f32 %v1338_v38, %v1337_v35  ;;  %v1387_v46 = vadd.f32 %v1386_v41, %v1385_v36  ;;  %v1340_v47 = vpop.f32.mrb[26].mxu0  ;;  %v1388_v48 = vpop.f32.mrb[26].mxu1 }
 0x145   : > { %916 = vst.msk [vmem:[%s1805_s30 + $0x60] sm:$0xff] %vm340_vm1, %v896_v34  ;;  %v1341_v50 = vpop.f32.mrb[27].mxu0  ;;  %v1389_v52 = vpop.f32.mrb[27].mxu1 }
 0x146   : > { %v793_v53 = vadd.f32 %v1339_v45, %v408_v37  ;;  %v809_v54 = vadd.f32 %v1387_v46, %v424_v40  ;;  %v1342_v55 = vadd.f32 %v1341_v50, %v1340_v47  ;;  %v1390_v56 = vadd.f32 %v1389_v52, %v1388_v48 }
 0x147   : > { %v1891_v58 = vld [vmem:[#allocation2 + $0x50] sm:$0xff] }
 0x148   : > { %826 = vst.msk [vmem:[#allocation2 + $0x60] sm:$0xff] %vm340_vm1, %v793_v53  ;;  %842 = vst.msk [vmem:[#allocation2 + $0xe0] sm:$0xff] %vm340_vm1, %v809_v54  ;;  %v794_v59 = vadd.f32 %v1342_v55, %v409_v49  ;;  %v810_v63 = vadd.f32 %v1390_v56, %v425_v51  ;;  %v1895_v0 = vld [vmem:[#allocation2 + $0xd0] sm:$0xff] }
 0x149   : > { %v1897_v2 = vld [vmem:[#allocation2 + $0x58] sm:$0xff]  ;;  %934 = vst.msk [vmem:[%s2601_s2 + $0x50] sm:$0xff] (!%p1278_p7), %vm340_vm1, %v1891_v58  ;;  %950 = vst.msk [vmem:[%s2601_s2 + $0xd0] sm:$0xff] (!%p1278_p7), %vm340_vm1, %v1895_v0 }
 0x14a   : > { %v1899_v3 = vld [vmem:[#allocation2 + $0xd8] sm:$0xff]  ;;  %v889_v7 = vpack.c.bf16 %v1897_v2, %v1891_v58  ;;  %827 = vst.msk [vmem:[#allocation2 + $0x68] sm:$0xff] %vm340_vm1, %v794_v59  ;;  %843 = vst.msk [vmem:[#allocation2 + $0xe8] sm:$0xff] %vm340_vm1, %v810_v63  ;;  %v1343_v9 = vpop.f32.mrb[28].mxu0  ;;  %v1391_v10 = vpop.f32.mrb[28].mxu1 }
 0x14b   : > { %v897_v8 = vpack.c.bf16 %v1899_v3, %v1895_v0  ;;  %v1344_v12 = vpop.f32.mrb[29].mxu0  ;;  %v1392_v14 = vpop.f32.mrb[29].mxu1  ;;  %935 = vst.msk [vmem:[%s2601_s2 + $0x58] sm:$0xff] (!%p1278_p7), %vm340_vm1, %v1897_v2  ;;  %951 = vst.msk [vmem:[%s2601_s2 + $0xd8] sm:$0xff] (!%p1278_p7), %vm340_vm1, %v1899_v3 }
 0x14c   : > { %909 = vst.msk [vmem:[%s1805_s30 + $0x28] sm:$0xff] %vm340_vm1, %v889_v7  ;;  %v1345_v15 = vadd.f32 %v1344_v12, %v1343_v9  ;;  %v1393_v16 = vadd.f32 %v1392_v14, %v1391_v10  ;;  %v1346_v17 = vpop.f32.mrb[30].mxu0  ;;  %v1394_v18 = vpop.f32.mrb[30].mxu1 }
 0x14d   : > { %917 = vst.msk [vmem:[%s1805_s30 + $0x68] sm:$0xff] %vm340_vm1, %v897_v8  ;;  %v1347_v20 = vpop.f32.mrb[31].mxu0  ;;  %v1395_v22 = vpop.f32.mrb[31].mxu1 }
 0x14e   : > { %v795_v24 = vadd.f32 %v1345_v15, %v410_v11  ;;  %v811_v25 = vadd.f32 %v1393_v16, %v426_v13  ;;  %v1348_v33 = vadd.f32 %v1347_v20, %v1346_v17  ;;  %v1396_v34 = vadd.f32 %v1395_v22, %v1394_v18 }
 0x14f   : > { %v1911_v35 = vld [vmem:[#allocation2 + $0x60] sm:$0xff] }
 0x150   : > { %828 = vst.msk [vmem:[#allocation2 + $0x70] sm:$0xff] %vm340_vm1, %v795_v24  ;;  %844 = vst.msk [vmem:[#allocation2 + $0xf0] sm:$0xff] %vm340_vm1, %v811_v25  ;;  %v796_v36 = vadd.f32 %v1348_v33, %v411_v19  ;;  %v812_v37 = vadd.f32 %v1396_v34, %v427_v21  ;;  %v1915_v38 = vld [vmem:[#allocation2 + $0xe0] sm:$0xff] }
 0x151   : > { %v1917_v40 = vld [vmem:[#allocation2 + $0x68] sm:$0xff]  ;;  %936 = vst.msk [vmem:[%s2601_s2 + $0x60] sm:$0xff] (!%p1278_p7), %vm340_vm1, %v1911_v35  ;;  %952 = vst.msk [vmem:[%s2601_s2 + $0xe0] sm:$0xff] (!%p1278_p7), %vm340_vm1, %v1915_v38 }
 0x152   : > { %v1919_v41 = vld [vmem:[#allocation2 + $0xe8] sm:$0xff]  ;;  %v890_v45 = vpack.c.bf16 %v1917_v40, %v1911_v35  ;;  %829 = vst.msk [vmem:[#allocation2 + $0x78] sm:$0xff] %vm340_vm1, %v796_v36  ;;  %845 = vst.msk [vmem:[#allocation2 + $0xf8] sm:$0xff] %vm340_vm1, %v812_v37 }
 0x153   : > { %v898_v46 = vpack.c.bf16 %v1919_v41, %v1915_v38  ;;  %937 = vst.msk [vmem:[%s2601_s2 + $0x68] sm:$0xff] (!%p1278_p7), %vm340_vm1, %v1917_v40  ;;  %953 = vst.msk [vmem:[%s2601_s2 + $0xe8] sm:$0xff] (!%p1278_p7), %vm340_vm1, %v1919_v41 }
 0x154   : > { %910 = vst.msk [vmem:[%s1805_s30 + $0x30] sm:$0xff] %vm340_vm1, %v890_v45 }
 0x155   : > { %918 = vst.msk [vmem:[%s1805_s30 + $0x70] sm:$0xff] %vm340_vm1, %v898_v46 }
 0x157   : > { %v1931_v47 = vld [vmem:[#allocation2 + $0x70] sm:$0xff]  ;;  %922 = sbr.rel (%p1278_p7) target bundleno = 350 (0x15e), region = 44 }
 0x158   : > { %v1933_v48 = vld [vmem:[#allocation2 + $0xf0] sm:$0xff]  ;;  %938 = vst.msk [vmem:[%s2601_s2 + $0x70] sm:$0xff] (!%p1278_p7), %vm340_vm1, %v1931_v47 }
 0x159   : > { %v1935_v49 = vld [vmem:[#allocation2 + $0x78] sm:$0xff]  ;;  %954 = vst.msk [vmem:[%s2601_s2 + $0xf0] sm:$0xff] (!%p1278_p7), %vm340_vm1, %v1933_v48 }
 0x15a   : > { %v1937_v50 = vld [vmem:[#allocation2 + $0xf8] sm:$0xff]  ;;  %v891_v51 = vpack.c.bf16 %v1935_v49, %v1931_v47  ;;  %939 = vst.msk [vmem:[%s2601_s2 + $0x78] sm:$0xff] (!%p1278_p7), %vm340_vm1, %v1935_v49 }
 0x15b   : > { %v899_v52 = vpack.c.bf16 %v1937_v50, %v1933_v48  ;;  %955 = vst.msk [vmem:[%s2601_s2 + $0xf8] sm:$0xff] (!%p1278_p7), %vm340_vm1, %v1937_v50 }
 0x15c   : > { %911 = vst.msk [vmem:[%s1805_s30 + $0x38] sm:$0xff] %vm340_vm1, %v891_v51 }
 0x15d   : > { %919 = vst.msk [vmem:[%s1805_s30 + $0x78] sm:$0xff] %vm340_vm1, %v899_v52 }
 0x15e PF: > { %p1279_p8 = scmp.le.s32.totalorder %s1516_s9, 0 }
 0x15f   : > { %v961_v53 = vld [vmem:[%s2601_s2] sm:$0xff] (!%p1279_p8)  ;;  %v962_v54 = vld [vmem:[%s2601_s2 + $0x8] sm:$0xff] (!%p1279_p8)  ;;  %v963_v55 = vld [vmem:[%s2601_s2 + $0x10] sm:$0xff] (!%p1279_p8) }
 0x160   : > { %959 = sbr.rel (%p1279_p8) target bundleno = 370 (0x172), region = 48  ;;  %v993_v56 = vadd.f32 (!%p1279_p8), %v961_v53, %v1789_v39  ;;  %v994_v59 = vadd.f32 (!%p1279_p8), %v962_v54, %v1795_v43  ;;  %v995_v63 = vadd.f32 (!%p1279_p8), %v963_v55, %v1811_v1  ;;  %v964_v7 = vld [vmem:[%s2601_s2 + $0x18] sm:$0xff] (!%p1279_p8)  ;;  %v965_v8 = vld [vmem:[%s2601_s2 + $0x20] sm:$0xff] (!%p1279_p8)  ;;  %v966_v9 = vld [vmem:[%s2601_s2 + $0x28] sm:$0xff] (!%p1279_p8) }
 0x161   : > { %v996_v10 = vadd.f32 (!%p1279_p8), %v964_v7, %v1817_v5  ;;  %v997_v39 = vadd.f32 (!%p1279_p8), %v965_v8, %v1831_v27  ;;  %v998_v43 = vadd.f32 (!%p1279_p8), %v966_v9, %v1837_v31  ;;  %v967_v1 = vld [vmem:[%s2601_s2 + $0x30] sm:$0xff] (!%p1279_p8)  ;;  %v968_v11 = vld [vmem:[%s2601_s2 + $0x38] sm:$0xff] (!%p1279_p8)  ;;  %v969_v12 = vld [vmem:[%s2601_s2 + $0x40] sm:$0xff] (!%p1279_p8) }
 0x162   : > { %1025 = vst.msk [vmem:[%s2601_s2] sm:$0xff] (!%p1279_p8), %vm340_vm1, %v993_v56  ;;  %1026 = vst.msk [vmem:[%s2601_s2 + $0x8] sm:$0xff] (!%p1279_p8), %vm340_vm1, %v994_v59  ;;  %v999_v5 = vadd.f32 (!%p1279_p8), %v967_v1, %v1851_v57  ;;  %v1000_v27 = vadd.f32 (!%p1279_p8), %v968_v11, %v1857_v61  ;;  %v1001_v31 = vadd.f32 (!%p1279_p8), %v969_v12, %v1871_v23  ;;  %v970_v13 = vld [vmem:[%s2601_s2 + $0x48] sm:$0xff] (!%p1279_p8)  ;;  %v971_v14 = vld [vmem:[%s2601_s2 + $0x50] sm:$0xff] (!%p1279_p8) }
 0x163   : > { %1027 = vst.msk [vmem:[%s2601_s2 + $0x10] sm:$0xff] (!%p1279_p8), %vm340_vm1, %v995_v63  ;;  %v972_v15 = vld [vmem:[%s2601_s2 + $0x58] sm:$0xff] (!%p1279_p8)  ;;  %1028 = vst.msk [vmem:[%s2601_s2 + $0x18] sm:$0xff] (!%p1279_p8), %vm340_vm1, %v996_v10  ;;  %v1002_v57 = vadd.f32 (!%p1279_p8), %v970_v13, %v1877_v28  ;;  %v1003_v61 = vadd.f32 (!%p1279_p8), %v971_v14, %v1891_v58  ;;  %v973_v16 = vld [vmem:[%s2601_s2 + $0x60] sm:$0xff] (!%p1279_p8) }
 0x164   : > { %1029 = vst.msk [vmem:[%s2601_s2 + $0x20] sm:$0xff] (!%p1279_p8), %vm340_vm1, %v997_v39  ;;  %1030 = vst.msk [vmem:[%s2601_s2 + $0x28] sm:$0xff] (!%p1279_p8), %vm340_vm1, %v998_v43  ;;  %v1004_v23 = vadd.f32 (!%p1279_p8), %v972_v15, %v1897_v2  ;;  %v974_v17 = vld [vmem:[%s2601_s2 + $0x68] sm:$0xff] (!%p1279_p8)  ;;  %v975_v18 = vld [vmem:[%s2601_s2 + $0x70] sm:$0xff] (!%p1279_p8)  ;;  %v1005_v28 = vadd.f32 (!%p1279_p8), %v973_v16, %v1911_v35 }
 0x165   : > { %1031 = vst.msk [vmem:[%s2601_s2 + $0x30] sm:$0xff] (!%p1279_p8), %vm340_vm1, %v999_v5  ;;  %1032 = vst.msk [vmem:[%s2601_s2 + $0x38] sm:$0xff] (!%p1279_p8), %vm340_vm1, %v1000_v27  ;;  %v1006_v58 = vadd.f32 (!%p1279_p8), %v974_v17, %v1917_v40  ;;  %v1007_v2 = vadd.f32 (!%p1279_p8), %v975_v18, %v1931_v47  ;;  %v976_v19 = vld [vmem:[%s2601_s2 + $0x78] sm:$0xff] (!%p1279_p8)  ;;  %v977_v20 = vld [vmem:[%s2601_s2 + $0x80] sm:$0xff] (!%p1279_p8) }
 0x166   : > { %1033 = vst.msk [vmem:[%s2601_s2 + $0x40] sm:$0xff] (!%p1279_p8), %vm340_vm1, %v1001_v31  ;;  %v978_v21 = vld [vmem:[%s2601_s2 + $0x88] sm:$0xff] (!%p1279_p8)  ;;  %1034 = vst.msk [vmem:[%s2601_s2 + $0x48] sm:$0xff] (!%p1279_p8), %vm340_vm1, %v1002_v57  ;;  %v1008_v22 = vadd.f32 (!%p1279_p8), %v976_v19, %v1935_v49  ;;  %v1009_v24 = vadd.f32 (!%p1279_p8), %v977_v20, %v1793_v42  ;;  %v979_v33 = vld [vmem:[%s2601_s2 + $0x90] sm:$0xff] (!%p1279_p8) }
 0x167   : > { %1035 = vst.msk [vmem:[%s2601_s2 + $0x50] sm:$0xff] %vm340_vm1, %v1003_v61  ;;  %1036 = vst.msk [vmem:[%s2601_s2 + $0x58] sm:$0xff] %vm340_vm1, %v1004_v23  ;;  %v1010_v25 = vadd.f32 %v978_v21, %v1797_v44  ;;  %v980_v34 = vld [vmem:[%s2601_s2 + $0x98] sm:$0xff]  ;;  %v981_v35 = vld [vmem:[%s2601_s2 + $0xa0] sm:$0xff]  ;;  %v1011_v42 = vadd.f32 %v979_v33, %v1815_v4 }
 0x168   : > { %1037 = vst.msk [vmem:[%s2601_s2 + $0x60] sm:$0xff] %vm340_vm1, %v1005_v28  ;;  %1038 = vst.msk [vmem:[%s2601_s2 + $0x68] sm:$0xff] %vm340_vm1, %v1006_v58  ;;  %v1012_v44 = vadd.f32 %v980_v34, %v1819_v6  ;;  %v1013_v36 = vadd.f32 %v981_v35, %v1835_v30  ;;  %v982_v37 = vld [vmem:[%s2601_s2 + $0xa8] sm:$0xff]  ;;  %v983_v40 = vld [vmem:[%s2601_s2 + $0xb0] sm:$0xff] }
 0x169   : > { %1039 = vst.msk [vmem:[%s2601_s2 + $0x70] sm:$0xff] %vm340_vm1, %v1007_v2  ;;  %v984_v45 = vld [vmem:[%s2601_s2 + $0xb8] sm:$0xff]  ;;  %1040 = vst.msk [vmem:[%s2601_s2 + $0x78] sm:$0xff] %vm340_vm1, %v1008_v22  ;;  %v1014_v4 = vadd.f32 %v982_v37, %v1839_v32  ;;  %v1015_v6 = vadd.f32 %v983_v40, %v1855_v60  ;;  %v985_v46 = vld [vmem:[%s2601_s2 + $0xc0] sm:$0xff] }
 0x16a   : > { %1041 = vst.msk [vmem:[%s2601_s2 + $0x80] sm:$0xff] %vm340_vm1, %v1009_v24  ;;  %1042 = vst.msk [vmem:[%s2601_s2 + $0x88] sm:$0xff] %vm340_vm1, %v1010_v25  ;;  %v1016_v30 = vadd.f32 %v984_v45, %v1859_v62  ;;  %v986_v47 = vld [vmem:[%s2601_s2 + $0xc8] sm:$0xff]  ;;  %v987_v49 = vld [vmem:[%s2601_s2 + $0xd0] sm:$0xff]  ;;  %v1017_v32 = vadd.f32 %v985_v46, %v1875_v26 }
 0x16b   : > { %1043 = vst.msk [vmem:[%s2601_s2 + $0x90] sm:$0xff] %vm340_vm1, %v1011_v42  ;;  %1044 = vst.msk [vmem:[%s2601_s2 + $0x98] sm:$0xff] %vm340_vm1, %v1012_v44  ;;  %v1018_v60 = vadd.f32 %v986_v47, %v1879_v29  ;;  %v1019_v62 = vadd.f32 %v987_v49, %v1895_v0  ;;  %v988_v51 = vld [vmem:[%s2601_s2 + $0xd8] sm:$0xff]  ;;  %v989_v52 = vld [vmem:[%s2601_s2 + $0xe0] sm:$0xff] }
 0x16c   : > { %1045 = vst.msk [vmem:[%s2601_s2 + $0xa0] sm:$0xff] %vm340_vm1, %v1013_v36  ;;  %v990_v53 = vld [vmem:[%s2601_s2 + $0xe8] sm:$0xff]  ;;  %1046 = vst.msk [vmem:[%s2601_s2 + $0xa8] sm:$0xff] %vm340_vm1, %v1014_v4  ;;  %v1020_v26 = vadd.f32 %v988_v51, %v1899_v3  ;;  %v1021_v29 = vadd.f32 %v989_v52, %v1915_v38  ;;  %v991_v54 = vld [vmem:[%s2601_s2 + $0xf0] sm:$0xff] }
 0x16d   : > { %1047 = vst.msk [vmem:[%s2601_s2 + $0xb0] sm:$0xff] %vm340_vm1, %v1015_v6  ;;  %1048 = vst.msk [vmem:[%s2601_s2 + $0xb8] sm:$0xff] %vm340_vm1, %v1016_v30  ;;  %v1022_v0 = vadd.f32 %v990_v53, %v1919_v41  ;;  %v992_v55 = vld [vmem:[%s2601_s2 + $0xf8] sm:$0xff]  ;;  %v1023_v3 = vadd.f32 %v991_v54, %v1933_v48 }
 0x16e   : > { %1049 = vst.msk [vmem:[%s2601_s2 + $0xc0] sm:$0xff] %vm340_vm1, %v1017_v32  ;;  %1050 = vst.msk [vmem:[%s2601_s2 + $0xc8] sm:$0xff] %vm340_vm1, %v1018_v60  ;;  %v1024_v38 = vadd.f32 %v992_v55, %v1937_v50 }
 0x16f   : > { %1051 = vst.msk [vmem:[%s2601_s2 + $0xd0] sm:$0xff] %vm340_vm1, %v1019_v62  ;;  %1052 = vst.msk [vmem:[%s2601_s2 + $0xd8] sm:$0xff] %vm340_vm1, %v1020_v26 }
 0x170   : > { %1053 = vst.msk [vmem:[%s2601_s2 + $0xe0] sm:$0xff] %vm340_vm1, %v1021_v29  ;;  %1054 = vst.msk [vmem:[%s2601_s2 + $0xe8] sm:$0xff] %vm340_vm1, %v1022_v0 }
 0x171   : > { %1055 = vst.msk [vmem:[%s2601_s2 + $0xf0] sm:$0xff] %vm340_vm1, %v1023_v3  ;;  %1056 = vst.msk [vmem:[%s2601_s2 + $0xf8] sm:$0xff] %vm340_vm1, %v1024_v38 }
 0x172 PF: > { %p1280_p9 = scmp.ne.s32.totalorder %s1516_s9, 2 }
 0x173   : > { %v1074_v16 = vld [vmem:[%s2601_s2 + $0x60] sm:$0xff] (!%p1280_p9)  ;;  %v1075_v17 = vld [vmem:[%s2601_s2 + $0x68] sm:$0xff] (!%p1280_p9)  ;;  %v1076_v18 = vld [vmem:[%s2601_s2 + $0x70] sm:$0xff] (!%p1280_p9) }
 0x174   : > { %1060 = sbr.rel (%p1280_p9) target bundleno = 395 (0x18b), region = 52  ;;  %v1062_v41 = vld [vmem:[%s2601_s2] sm:$0xff] (!%p1280_p9)  ;;  %v1063_v48 = vld [vmem:[%s2601_s2 + $0x8] sm:$0xff] (!%p1280_p9)  ;;  %v1106_v28 = vmul.f32 (!%p1280_p9), 0.33333334, %v1074_v16  ;;  %v1077_v19 = vld [vmem:[%s2601_s2 + $0x78] sm:$0xff] (!%p1280_p9) }
 0x175   : > { %v1064_v50 = vld [vmem:[%s2601_s2 + $0x10] sm:$0xff] (!%p1280_p9)  ;;  %v1094_v56 = vmul.f32 (!%p1280_p9), 0.33333334, %v1062_v41  ;;  %v1095_v59 = vmul.f32 (!%p1280_p9), 0.33333334, %v1063_v48  ;;  %v1065_v7 = vld [vmem:[%s2601_s2 + $0x18] sm:$0xff] (!%p1280_p9) }
 0x176   : > { %v1096_v63 = vmul.f32 (!%p1280_p9), 0.33333334, %v1064_v50  ;;  %v1066_v8 = vld [vmem:[%s2601_s2 + $0x20] sm:$0xff] (!%p1280_p9)  ;;  %v1067_v9 = vld [vmem:[%s2601_s2 + $0x28] sm:$0xff] (!%p1280_p9)  ;;  %v1097_v10 = vmul.f32 (!%p1280_p9), 0.33333334, %v1065_v7 }
 0x177   : > { %1126 = vst.msk [vmem:[%s2601_s2] sm:$0xff] (!%p1280_p9), %vm340_vm1, %v1094_v56  ;;  %1127 = vst.msk [vmem:[%s2601_s2 + $0x8] sm:$0xff] (!%p1280_p9), %vm340_vm1, %v1095_v59  ;;  %v1098_v39 = vmul.f32 (!%p1280_p9), 0.33333334, %v1066_v8  ;;  %v1099_v43 = vmul.f32 (!%p1280_p9), 0.33333334, %v1067_v9 }
 0x178   : > { %1128 = vst.msk [vmem:[%s2601_s2 + $0x10] sm:$0xff] (!%p1280_p9), %vm340_vm1, %v1096_v63  ;;  %v1068_v1 = vld [vmem:[%s2601_s2 + $0x30] sm:$0xff] (!%p1280_p9)  ;;  %v1069_v11 = vld [vmem:[%s2601_s2 + $0x38] sm:$0xff] (!%p1280_p9)  ;;  %v1070_v12 = vld [vmem:[%s2601_s2 + $0x40] sm:$0xff] (!%p1280_p9)  ;;  %v1107_v58 = vmul.f32 (!%p1280_p9), 0.33333334, %v1075_v17 }
 0x179   : > { %1129 = vst.msk [vmem:[%s2601_s2 + $0x18] sm:$0xff] (!%p1280_p9), %vm340_vm1, %v1097_v10  ;;  %1130 = vst.msk [vmem:[%s2601_s2 + $0x20] sm:$0xff] (!%p1280_p9), %vm340_vm1, %v1098_v39  ;;  %v1100_v5 = vmul.f32 (!%p1280_p9), 0.33333334, %v1068_v1  ;;  %v1101_v27 = vmul.f32 (!%p1280_p9), 0.33333334, %v1069_v11 }
 0x17a   : > { %1131 = vst.msk [vmem:[%s2601_s2 + $0x28] sm:$0xff] (!%p1280_p9), %vm340_vm1, %v1099_v43  ;;  %v1102_v31 = vmul.f32 (!%p1280_p9), 0.33333334, %v1070_v12  ;;  %v1071_v13 = vld [vmem:[%s2601_s2 + $0x48] sm:$0xff] (!%p1280_p9)  ;;  %v1072_v14 = vld [vmem:[%s2601_s2 + $0x50] sm:$0xff] (!%p1280_p9)  ;;  %v1073_v15 = vld [vmem:[%s2601_s2 + $0x58] sm:$0xff] (!%p1280_p9) }
 0x17b   : > { %1132 = vst.msk [vmem:[%s2601_s2 + $0x30] sm:$0xff] %vm340_vm1, %v1100_v5  ;;  %1133 = vst.msk [vmem:[%s2601_s2 + $0x38] sm:$0xff] %vm340_vm1, %v1101_v27  ;;  %v1103_v57 = vmul.f32 0.33333334, %v1071_v13  ;;  %v1104_v61 = vmul.f32 0.33333334, %v1072_v14 }
 0x17c   : > { %1134 = vst.msk [vmem:[%s2601_s2 + $0x40] sm:$0xff] %vm340_vm1, %v1102_v31  ;;  %v1105_v23 = vmul.f32 0.33333334, %v1073_v15  ;;  %v1108_v2 = vmul.f32 0.33333334, %v1076_v18  ;;  %v1078_v20 = vld [vmem:[%s2601_s2 + $0x80] sm:$0xff] }
 0x17d   : > { %1135 = vst.msk [vmem:[%s2601_s2 + $0x48] sm:$0xff] %vm340_vm1, %v1103_v57  ;;  %1136 = vst.msk [vmem:[%s2601_s2 + $0x50] sm:$0xff] %vm340_vm1, %v1104_v61  ;;  %v1079_v21 = vld [vmem:[%s2601_s2 + $0x88] sm:$0xff]  ;;  %v1109_v22 = vmul.f32 0.33333334, %v1077_v19  ;;  %v1080_v33 = vld [vmem:[%s2601_s2 + $0x90] sm:$0xff] }
 0x17e   : > { %1137 = vst.msk [vmem:[%s2601_s2 + $0x58] sm:$0xff] %vm340_vm1, %v1105_v23  ;;  %1138 = vst.msk [vmem:[%s2601_s2 + $0x60] sm:$0xff] %vm340_vm1, %v1106_v28  ;;  %v1110_v24 = vmul.f32 0.33333334, %v1078_v20  ;;  %v1111_v25 = vmul.f32 0.33333334, %v1079_v21 }
 0x17f   : > { %1139 = vst.msk [vmem:[%s2601_s2 + $0x68] sm:$0xff] %vm340_vm1, %v1107_v58  ;;  %1140 = vst.msk [vmem:[%s2601_s2 + $0x70] sm:$0xff] %vm340_vm1, %v1108_v2  ;;  %v1081_v34 = vld [vmem:[%s2601_s2 + $0x98] sm:$0xff]  ;;  %v1082_v35 = vld [vmem:[%s2601_s2 + $0xa0] sm:$0xff]  ;;  %v1112_v42 = vmul.f32 0.33333334, %v1080_v33 }
 0x180   : > { %1141 = vst.msk [vmem:[%s2601_s2 + $0x78] sm:$0xff] %vm340_vm1, %v1109_v22  ;;  %1142 = vst.msk [vmem:[%s2601_s2 + $0x80] sm:$0xff] %vm340_vm1, %v1110_v24  ;;  %v1113_v44 = vmul.f32 0.33333334, %v1081_v34  ;;  %v1114_v36 = vmul.f32 0.33333334, %v1082_v35 }
 0x181   : > { %1143 = vst.msk [vmem:[%s2601_s2 + $0x88] sm:$0xff] %vm340_vm1, %v1111_v25  ;;  %v1083_v37 = vld [vmem:[%s2601_s2 + $0xa8] sm:$0xff]  ;;  %v1084_v40 = vld [vmem:[%s2601_s2 + $0xb0] sm:$0xff]  ;;  %v1085_v45 = vld [vmem:[%s2601_s2 + $0xb8] sm:$0xff] }
 0x182   : > { %1144 = vst.msk [vmem:[%s2601_s2 + $0x90] sm:$0xff] %vm340_vm1, %v1112_v42  ;;  %1145 = vst.msk [vmem:[%s2601_s2 + $0x98] sm:$0xff] %vm340_vm1, %v1113_v44  ;;  %v1115_v4 = vmul.f32 0.33333334, %v1083_v37  ;;  %v1116_v6 = vmul.f32 0.33333334, %v1084_v40 }
 0x183   : > { %1146 = vst.msk [vmem:[%s2601_s2 + $0xa0] sm:$0xff] %vm340_vm1, %v1114_v36  ;;  %v1117_v30 = vmul.f32 0.33333334, %v1085_v45  ;;  %v1086_v46 = vld [vmem:[%s2601_s2 + $0xc0] sm:$0xff]  ;;  %v1087_v47 = vld [vmem:[%s2601_s2 + $0xc8] sm:$0xff]  ;;  %v1088_v49 = vld [vmem:[%s2601_s2 + $0xd0] sm:$0xff] }
 0x184   : > { %1147 = vst.msk [vmem:[%s2601_s2 + $0xa8] sm:$0xff] %vm340_vm1, %v1115_v4  ;;  %1148 = vst.msk [vmem:[%s2601_s2 + $0xb0] sm:$0xff] %vm340_vm1, %v1116_v6  ;;  %v1118_v32 = vmul.f32 0.33333334, %v1086_v46  ;;  %v1119_v60 = vmul.f32 0.33333334, %v1087_v47 }
 0x185   : > { %1149 = vst.msk [vmem:[%s2601_s2 + $0xb8] sm:$0xff] %vm340_vm1, %v1117_v30  ;;  %v1120_v62 = vmul.f32 0.33333334, %v1088_v49  ;;  %v1089_v51 = vld [vmem:[%s2601_s2 + $0xd8] sm:$0xff]  ;;  %v1090_v52 = vld [vmem:[%s2601_s2 + $0xe0] sm:$0xff]  ;;  %v1091_v53 = vld [vmem:[%s2601_s2 + $0xe8] sm:$0xff] }
 0x186   : > { %1150 = vst.msk [vmem:[%s2601_s2 + $0xc0] sm:$0xff] %vm340_vm1, %v1118_v32  ;;  %1151 = vst.msk [vmem:[%s2601_s2 + $0xc8] sm:$0xff] %vm340_vm1, %v1119_v60  ;;  %v1121_v26 = vmul.f32 0.33333334, %v1089_v51  ;;  %v1122_v29 = vmul.f32 0.33333334, %v1090_v52 }
 0x187   : > { %1152 = vst.msk [vmem:[%s2601_s2 + $0xd0] sm:$0xff] %vm340_vm1, %v1120_v62  ;;  %v1123_v0 = vmul.f32 0.33333334, %v1091_v53  ;;  %v1092_v54 = vld [vmem:[%s2601_s2 + $0xf0] sm:$0xff]  ;;  %v1093_v55 = vld [vmem:[%s2601_s2 + $0xf8] sm:$0xff] }
 0x188   : > { %1153 = vst.msk [vmem:[%s2601_s2 + $0xd8] sm:$0xff] %vm340_vm1, %v1121_v26  ;;  %1154 = vst.msk [vmem:[%s2601_s2 + $0xe0] sm:$0xff] %vm340_vm1, %v1122_v29  ;;  %v1124_v3 = vmul.f32 0.33333334, %v1092_v54  ;;  %v1125_v38 = vmul.f32 0.33333334, %v1093_v55 }
 0x189   : > { %1155 = vst.msk [vmem:[%s2601_s2 + $0xe8] sm:$0xff] %vm340_vm1, %v1123_v0 }
 0x18a   : > { %1156 = vst.msk [vmem:[%s2601_s2 + $0xf0] sm:$0xff] %vm340_vm1, %v1124_v3  ;;  %1157 = vst.msk [vmem:[%s2601_s2 + $0xf8] sm:$0xff] %vm340_vm1, %v1125_v38 }
 0x18b PF: > { %s12_s11 = sadd.s32 1, %s1524_s11   ;;  %s2602_s9 = smov %s1520_s10 }
 0x18c   : > { %p9_p10 = scmp.ge.s32.totalorder %s12_s11, 5   ;;  %s2603_s10 = smov %s2605_s12 }
 0x18e   :  { %11 = sbr.rel (!%p9_p10) target bundleno = 2 (0x2), region = 83 }

</bundles_post_ra>
